<compile_context>
chip_gen: v7x
topology: tpu7x:2x2x1
jax: 0.10.0
libtpu: 0.0.40
codegen_flags: <defaults>
</compile_context>

<pallas_src>
import functools

import jax
import jax.numpy as jnp
from jax.experimental import pallas as pl
from jax.experimental.pallas import tpu as pltpu


def _round_up(x, m):
    return ((x + m - 1) // m) * m


def _vmem_capacity_bytes():
    """Trace-time VMEM capacity query with a conservative (v7x per-TC) fallback."""
    try:
        cap = int(pltpu.get_tpu_info().vmem_capacity_bytes)
        if cap > 0:
            return cap
    except Exception:
        pass
    return 64 * 2**20


def _pick_tn(k_pad, n128, budget_bytes, tm, w_itemsize=2, x_itemsize=2, tn_cap=4096):
    """Pick the weight-panel width tn (multiple of 128) whose double-buffered footprint
    fits the VMEM budget, minimizing streamed zero-column waste plus per-grid-step
    overhead (~0.35us/step, expressed as equivalent weight columns)."""
    best = None
    for tn in range(128, min(n128, tn_cap) + 1, 128):
        foot = (2 * k_pad * tn * w_itemsize      # weight panels (double-buffered)
                + 2 * tm * k_pad * x_itemsize    # resident x row block
                + 2 * tm * tn * x_itemsize       # output tile
                + 2 * tn * 4)                    # f32 bias panel
        if foot > budget_bytes:
            continue
        n_pad = _round_up(n128, tn)
        n_panels = n_pad // tn
        overhead_cols = max(1, (400 * 1024) // (k_pad * w_itemsize))
        cost = n_pad + n_panels * overhead_cols
        if best is None or cost < best[0] or (cost == best[0] and tn > best[1]):
            best = (cost, tn)
    return 128 if best is None else best[1]


def _linear_act_kernel(x_ref, w_ref, b_ref, o_ref, *, activation):
    # One full-K MXU dot per grid step; f32 accumulate, fused bias + activation.
    acc = jnp.dot(x_ref[...], w_ref[...], preferred_element_type=jnp.float32)
    out = acc + b_ref[...]
    if activation == "relu":
        out = jnp.maximum(out, 0.0)
    elif activation == "sigmoid":
        out = jax.nn.sigmoid(out)
    o_ref[...] = out.astype(o_ref.dtype)


def linear_act(x, w_tiled, b, activation):
    """y = act(x @ W + b) on pre-padded, pre-tiled parameters.

    x:       (M, K) activations. Only the first layer ever needs padding here; inter-layer
             activations already arrive padded to (m_pad, k_pad).
    w_tiled: (n_panels, k_pad, tn) bf16 — contiguous full-K weight column panels.
    b:       (1, n_pad) float32.
    Returns the padded (m_pad, n_pad) result; the caller slices only the final output.
    """
    n_panels, k_pad, tn = w_tiled.shape
    n_pad = n_panels * tn
    assert b.shape == (1, n_pad)

    M, K = x.shape
    assert K <= k_pad
    tm = min(128, _round_up(max(M, 1), 16))     # bf16 packed sublane tile is (16, 128)
    m_pad = _round_up(M, tm)
    if K != k_pad or M != m_pad:
        x = jnp.pad(x, ((0, m_pad - M), (0, k_pad - K)))   # tiny; first layer only
    m_blocks = m_pad // tm

    # N-panel axis first so v7x megacore shards the weight-streaming axis across its 2 TCs.
    grid = (n_panels, m_blocks)

    bytes_needed = (
        2 * k_pad * tn * w_tiled.dtype.itemsize   # weight panels (double-buffered)
        + 2 * tm * k_pad * x.dtype.itemsize       # resident x row block
        + 2 * tm * tn * x.dtype.itemsize          # output tile
        + 2 * tn * b.dtype.itemsize               # bias panel
    )
    vmem_cap = _vmem_capacity_bytes()
    vmem_limit = int(min(vmem_cap - 8 * 2**20,
                         max(32 * 2**20, int(1.2 * bytes_needed) + (2 << 20))))

    kernel = functools.partial(_linear_act_kernel, activation=activation)
    out = pl.pallas_call(
        kernel,
        out_shape=jax.ShapeDtypeStruct((m_pad, n_pad), x.dtype),
        grid_spec=pltpu.PrefetchScalarGridSpec(
            num_scalar_prefetch=0,
            grid=grid,
            in_specs=[
                # Full-K row block of x, resident across the whole N-panel sweep.
                pl.BlockSpec((tm, k_pad), lambda j, i: (i, 0)),
                # One contiguous pre-tiled weight slab per grid step.
                pl.BlockSpec((None, k_pad, tn), lambda j, i: (j, 0, 0)),
                pl.BlockSpec((1, tn), lambda j, i: (0, j)),
            ],
            out_specs=pl.BlockSpec((tm, tn), lambda j, i: (i, j)),
        ),
        compiler_params=pltpu.CompilerParams(
            dimension_semantics=("parallel",
                                 "parallel" if m_blocks > 1 else "arbitrary"),
            vmem_limit_bytes=vmem_limit,
        ),
    )(x, w_tiled, b)
    return out


def init_linear_params(key, in_features, out_features, *, k_pad, tm=16,
                       w_dtype=jnp.bfloat16, vmem_budget=None):
    """PyTorch nn.Linear default init (U(-1/sqrt(in), 1/sqrt(in))), then pre-pad and
    pre-tile once for the kernel:
        weight -> (n_panels, k_pad, tn) contiguous column panels (bf16),
        bias   -> (1, n_pad) float32.
    """
    if vmem_budget is None:
        vmem_budget = int(0.7 * _vmem_capacity_bytes())
    kw, kb = jax.random.split(key)
    bound = 1.0 / (in_features ** 0.5)
    w = jax.random.uniform(kw, (in_features, out_features), jnp.float32,
                           minval=-bound, maxval=bound)
    b = jax.random.uniform(kb, (1, out_features), jnp.float32,
                           minval=-bound, maxval=bound)

    itemsize = jnp.dtype(w_dtype).itemsize
    n128 = _round_up(out_features, 128)
    tn = _pick_tn(k_pad, n128, vmem_budget, tm, w_itemsize=itemsize, x_itemsize=itemsize)
    n_pad = _round_up(n128, tn)
    n_panels = n_pad // tn

    w_pad = jnp.pad(w.astype(w_dtype),
                    ((0, k_pad - in_features), (0, n_pad - out_features)))
    # Panel-major: each (k_pad, tn) weight panel is one contiguous HBM slab for the DMA.
    w_tiled = w_pad.reshape(k_pad, n_panels, tn).transpose(1, 0, 2)
    b_pad = jnp.pad(b, ((0, 0), (0, n_pad - out_features)))
    return w_tiled, b_pad


def init_model_params(key, layer_dims, w_dtype=jnp.bfloat16):
    """layer_dims = [input, h1, ..., out]. Pads each inter-layer dim consistently:
    layer i's padded output width (n_pad) is layer i+1's padded K, so activations stay
    padded end-to-end and only the final output needs a slice."""
    keys = jax.random.split(key, len(layer_dims) - 1)
    params = []
    k_pad = _round_up(layer_dims[0], 128)
    for i, (kin, nout) in enumerate(zip(layer_dims[:-1], layer_dims[1:])):
        w_tiled, b_pad = init_linear_params(keys[i], kin, nout, k_pad=k_pad, w_dtype=w_dtype)
        params.append((w_tiled, b_pad, nout))
        k_pad = b_pad.shape[1]   # next layer's padded K == this layer's padded N
    return params


def lol_character_predictor_forward(x, params):
    M = x.shape[0]
    n_layers = len(params)
    h = x
    for idx, (w_tiled, b_pad, _) in enumerate(params):
        act = "sigmoid" if idx == n_layers - 1 else "relu"
        h = linear_act(h, w_tiled, b_pad, act)
    return h[:M, :params[-1][2]]


def reference_forward(x, params, layer_dims):
    """Pure-JAX float32 reference, reconstructing dense weights from the tiled layout."""
    h = x.astype(jnp.float32)
    n_layers = len(params)
    for idx, ((w_tiled, b_pad, nout), kin) in enumerate(zip(params, layer_dims[:-1])):
        n_panels, k_pad, tn = w_tiled.shape
        w_full = w_tiled.transpose(1, 0, 2).reshape(k_pad, n_panels * tn)
        w = w_full[:kin, :nout].astype(jnp.float32)
        b = b_pad[:, :nout].astype(jnp.float32)
        h = h @ w + b
        h = jax.nn.sigmoid(h) if idx == n_layers - 1 else jnp.maximum(h, 0.0)
    return h


if __name__ == "__main__":
    key = jax.random.PRNGKey(0)
    kx, kp, kx2, kp2 = jax.random.split(key, 4)

    # --- Small, aligned shapes consistent with the module structure ---
    # (original: input=1680, hidden=10000 (x2), mid=5000, output=840)
    batch = 8
    dims = [256, 512, 512, 256, 128]   # input, fc1, fc2, fc3, fc4 outputs
    x = jax.random.normal(kx, (batch, dims[0]), jnp.float32).astype(jnp.bfloat16)
    params = init_model_params(kp, dims)

    out = jax.block_until_ready(lol_character_predictor_forward(x, params))
    ref = reference_forward(x, params, dims)
    assert out.shape == (batch, dims[-1])
    assert jnp.allclose(out.astype(jnp.float32), ref, atol=2e-2, rtol=2e-2)

    # --- Unaligned-shape sanity check (exercises the pad/pre-tile path used for the
    #     original 1680/10000/5000/840 dims, none of which are multiples of 128) ---
    dims2 = [200, 300, 300, 150, 130]
    b2 = 3
    x2 = jax.random.normal(kx2, (b2, dims2[0]), jnp.float32).astype(jnp.bfloat16)
    params2 = init_model_params(kp2, dims2)
    o2 = jax.block_until_ready(lol_character_predictor_forward(x2, params2))
    r2 = reference_forward(x2, params2, dims2)
    assert o2.shape == (b2, dims2[-1])
    assert jnp.allclose(o2.astype(jnp.float32), r2, atol=2e-2, rtol=2e-2)

    print("KERNEL_OK")
</pallas_src>

<mosaic_0001>
module attributes {stable_mosaic.version = 11 : i64} {
  func.func @_linear_act_kernel(%arg0: i32, %arg1: i32, %arg2: memref<16x256xbf16, #tpu.memory_space<vmem>>, %arg3: memref<1x256x512xbf16, #tpu.memory_space<vmem>>, %arg4: memref<1x512xf32, #tpu.memory_space<vmem>>, %arg5: memref<16x512xbf16, #tpu.memory_space<vmem>>) attributes {dimension_semantics = [#tpu.dimension_semantics<parallel>, #tpu.dimension_semantics<arbitrary>], iteration_bounds = array<i64: 1, 1>, scalar_prefetch = 0 : i64, scratch_operands = 0 : i64, tpu.core_type = #tpu.core_type<tc>, window_params = [{transform_indices = @transform_0, window_bounds = array<i64: 16, 256>}, {transform_indices = @transform_1, window_bounds = array<i64: 1, 256, 512>}, {transform_indices = @transform_2, window_bounds = array<i64: 1, 512>}, {transform_indices = @transform_3, window_bounds = array<i64: 16, 512>}]} {
    %c0 = arith.constant 0 : index
    %c0_0 = arith.constant 0 : index
    %0 = vector.load %arg2[%c0, %c0_0] : memref<16x256xbf16, #tpu.memory_space<vmem>>, vector<16x256xbf16>
    %c0_1 = arith.constant 0 : index
    %c0_2 = arith.constant 0 : index
    %c0_3 = arith.constant 0 : index
    %1 = vector.load %arg3[%c0_1, %c0_2, %c0_3] : memref<1x256x512xbf16, #tpu.memory_space<vmem>>, vector<1x256x512xbf16>
    %2 = vector.shape_cast %1 : vector<1x256x512xbf16> to vector<256x512xbf16>
    %cst = arith.constant dense<0.000000e+00> : vector<16x512xf32>
    %3 = tpu.matmul %0, %2, %cst {dimension_numbers = #tpu.dot_dimension_numbers<[1], [0], [0], [1], [0, 0, 1, 1], [], []>} : vector<16x256xbf16>, vector<256x512xbf16>, vector<16x512xf32> -> vector<16x512xf32>
    %c0_4 = arith.constant 0 : index
    %c0_5 = arith.constant 0 : index
    %4 = vector.load %arg4[%c0_4, %c0_5] : memref<1x512xf32, #tpu.memory_space<vmem>>, vector<1x512xf32>
    %5 = vector.broadcast %4 : vector<1x512xf32> to vector<16x512xf32>
    %6 = arith.addf %3, %5 : vector<16x512xf32>
    %cst_6 = arith.constant 0.000000e+00 : f32
    %7 = vector.broadcast %cst_6 : f32 to vector<16x512xf32>
    %8 = arith.maximumf %6, %7 : vector<16x512xf32>
    %9 = arith.truncf %8 : vector<16x512xf32> to vector<16x512xbf16>
    %c0_7 = arith.constant 0 : index
    %c0_8 = arith.constant 0 : index
    %10 = vector.load %arg5[%c0_7, %c0_8] : memref<16x512xbf16, #tpu.memory_space<vmem>>, vector<16x512xbf16>
    tpu.vector_store %arg5[%c0_7, %c0_8], %9 {strides = array<i32>} : memref<16x512xbf16, #tpu.memory_space<vmem>>, vector<16x512xbf16>,
    return
  }
  func.func @transform_0(%arg0: i32, %arg1: i32) -> (i32, i32) {
    %c0_i32 = arith.constant 0 : i32
    %c0_i32_0 = arith.constant 0 : i32
    return %arg1, %c0_i32 : i32, i32
  }
  func.func @transform_1(%arg0: i32, %arg1: i32) -> (i32, i32, i32) {
    %c0_i32 = arith.constant 0 : i32
    %c0_i32_0 = arith.constant 0 : i32
    %c0_i32_1 = arith.constant 0 : i32
    return %arg0, %c0_i32, %c0_i32_0 : i32, i32, i32
  }
  func.func @transform_2(%arg0: i32, %arg1: i32) -> (i32, i32) {
    %c0_i32 = arith.constant 0 : i32
    %c0_i32_0 = arith.constant 0 : i32
    return %c0_i32, %arg0 : i32, i32
  }
  func.func @transform_3(%arg0: i32, %arg1: i32) -> (i32, i32) {
    %c0_i32 = arith.constant 0 : i32
    return %arg1, %arg0 : i32, i32
  }
}

</mosaic_0001>

<bundles_post_ra>
// kernel: tpu_custom_call.1
= control target key start
LH: loop header
LB: loop body
LE: loop exit
PB: predicated region body
PF: predicated region fallthrough
CT: control target
= control target key end

     0   :  { %8 = vsyncpa [#allocation3], 0  ;;  %s925_s0 = inlined_call_operand.hbm [shape: bf16[16,256], index: 0, kind: input, shape index: {}]   ;;  %s926_s1 = inlined_call_operand.hbm [shape: bf16[1,256,512], index: 1, kind: input, shape index: {}]   ;;  %s927_s2 = inlined_call_operand.vmem [shape: f32[1,512], index: 2, kind: input, shape index: {}]   ;;  %s928_s3 = inlined_call_operand.hbm [shape: bf16[16,512], index: 3, kind: output, shape index: {}]  }
   0x1   :  { %9 = vsyncpa [#allocation6], 0 }
   0x2   :  { %10 = vsyncpa [#allocation4], 0  ;;  %s853_s12 = smov [#allocation2]   ;;  %s781_s16 = scalar_lea.hbm %s925_s0, 256 }
   0x3   :  { %s16_s13 = sshll.u32 %s853_s12, 4  ;;  %p782_p0 = scmp.ne.s32.totalorder %s925_s0, %s781_s16  ;;  %s17_s13 = int_to_ptr.vmem [resolvable:$true] %s16_s13 }
   0x4   :  { %p785_p1 = scmp.lt.u32.totalorder %s781_s16, %s925_s0 }
   0x6   :  { %p787_p2 = pnand %p785_p1, %p782_p0 }
   0x8   :  { %790 = shalt.err (!%p787_p2)
}
   0x9   :  { %s791_s21 = scalar_lea.vmem %s17_s13, 256  ;;  %p796_p4 = scmp.lt.s32.totalorder %s17_s13, %s17_s13 }
   0xa   :  { %p792_p3 = scmp.ne.s32.totalorder %s17_s13, %s791_s21  ;;  %p797_p5 = scmp.lt.s32.totalorder %s791_s21, %s791_s21 }
   0xc   :  { %p798_p6 = por %p797_p5, %p796_p4 }
   0xe   :  { %p799_p7 = pnand %p798_p6, %p792_p3 }
  0x10   :  { %802 = shalt.err (!%p799_p7)
}
  0x11   :  { %s854_s22 = smov 128   ;;  %s855_s23 = smov 8  }
  0x12   :  { %22 = dma.hbm_to_vmem [thread:$0]  %s925_s0, 256, %s17_s13, [#allocation3], %s854_s22, %s854_s22, %s855_s23  }
  0x13   :  { %s856_s26 = smov [#allocation5]   ;;  %s803_s30 = scalar_lea.hbm %s926_s1, 8192 }
  0x14   :  { %s28_s27 = sshll.u32 %s856_s26, 4  ;;  %p804_p8 = scmp.ne.s32.totalorder %s926_s1, %s803_s30  ;;  %s29_s27 = int_to_ptr.vmem [resolvable:$true] %s28_s27 }
  0x15   :  { %p807_p9 = scmp.lt.u32.totalorder %s803_s30, %s926_s1 }
  0x17   :  { %p809_p10 = pnand %p807_p9, %p804_p8 }
  0x19   :  { %812 = shalt.err (!%p809_p10)
}
  0x1a   :  { %s813_s8 = scalar_lea.vmem %s29_s27, 8192  ;;  %p818_p12 = scmp.lt.s32.totalorder %s29_s27, %s29_s27 }
  0x1b   :  { %p814_p11 = scmp.ne.s32.totalorder %s29_s27, %s813_s8  ;;  %p819_p13 = scmp.lt.s32.totalorder %s813_s8, %s813_s8 }
  0x1d   :  { %p820_p0 = por %p819_p13, %p818_p12 }
  0x1f   :  { %p821_p1 = pnand %p820_p0, %p814_p11 }
  0x21   :  { %824 = shalt.err (!%p821_p1)
}
  0x22   :  { %s857_s0 = smov 256   ;;  %s858_s9 = smov 16  }
  0x23   :  { %34 = dma.hbm_to_vmem [thread:$0]  %s926_s1, 8192, %s29_s27, [#allocation6], %s857_s0, %s857_s0, %s858_s9  }
  0x24   :  { %847 = dma.done.wait [#allocation3], 256  }
  0x25   :  { %848 = vsyncadd [#allocation3], 4294967040 }
  0x26   :  { %849 = dma.done.wait [#allocation6], 8192  }
  0x27   :  { %850 = vsyncadd [#allocation6], 4294959104  ;;  %v682_v0 = vld [vmem:[#allocation5 + $0x4] ss:$16 sps:$4 sm:$0xff]   ;;  %v684_v1 = vld [vmem:[#allocation5 + $0xc] ss:$16 sps:$4 sm:$0xff]  }
  0x28   :  { %461 = vmatprep.subr.bf16.mxu0 %v682_v0  ;;  %v686_v2 = vld [vmem:[#allocation5] ss:$16 sps:$4 sm:$0xff]   ;;  %v687_v3 = vld [vmem:[#allocation5 + $0x8] ss:$16 sps:$4 sm:$0xff]   ;;  %504 = vmatprep.subr.bf16.mxu1 %v684_v1  ;;  %v688_v4 = vld [vmem:[#allocation5 + $0x24] ss:$16 sps:$4 sm:$0xff]  }
  0x29   :  { %462 = vmatpush1.bf16.msra.mxu0 %v686_v2  ;;  %505 = vmatpush1.bf16.msra.mxu1 %v687_v3  ;;  %v690_v5 = vld [vmem:[#allocation5 + $0x2c] ss:$16 sps:$4 sm:$0xff]   ;;  %v692_v6 = vld [vmem:[#allocation5 + $0x20] ss:$16 sps:$4 sm:$0xff]   ;;  %v693_v7 = vld [vmem:[#allocation5 + $0x28] ss:$16 sps:$4 sm:$0xff]   ;;  %v111_v2 = vlaneseq }
  0x2a   :  { %463 = vmatprep.subr.bf16.mxu0 %v688_v4  ;;  %506 = vmatprep.subr.bf16.mxu1 %v690_v5  ;;  %v694_v8 = vld [vmem:[#allocation5 + $0x44] ss:$16 sps:$4 sm:$0xff]   ;;  %v696_v9 = vld [vmem:[#allocation5 + $0x4c] ss:$16 sps:$4 sm:$0xff]   ;;  %v698_v10 = vld [vmem:[#allocation5 + $0x40] ss:$16 sps:$4 sm:$0xff]  }
  0x2b   :  { %v699_v11 = vld [vmem:[#allocation5 + $0x48] ss:$16 sps:$4 sm:$0xff]   ;;  %v700_v12 = vld [vmem:[#allocation5 + $0x64] ss:$16 sps:$4 sm:$0xff]   ;;  %v702_v13 = vld [vmem:[#allocation5 + $0x6c] ss:$16 sps:$4 sm:$0xff]  }
  0x2c   :  { %v704_v14 = vld [vmem:[#allocation5 + $0x60] ss:$16 sps:$4 sm:$0xff]   ;;  %v705_v15 = vld [vmem:[#allocation5 + $0x68] ss:$16 sps:$4 sm:$0xff]   ;;  %v706_v16 = vld [vmem:[#allocation5 + $0x84] ss:$16 sps:$4 sm:$0xff]  }
  0x2d   :  { %464 = vmatpush1.bf16.msra.mxu0 %v692_v6  ;;  %507 = vmatpush1.bf16.msra.mxu1 %v693_v7  ;;  %v708_v17 = vld [vmem:[#allocation5 + $0x8c] ss:$16 sps:$4 sm:$0xff]   ;;  %v710_v18 = vld [vmem:[#allocation5 + $0x80] ss:$16 sps:$4 sm:$0xff]   ;;  %v711_v19 = vld [vmem:[#allocation5 + $0x88] ss:$16 sps:$4 sm:$0xff]  }
  0x2e   :  { %465 = vmatprep.subr.bf16.mxu0 %v694_v8  ;;  %508 = vmatprep.subr.bf16.mxu1 %v696_v9  ;;  %v712_v20 = vld [vmem:[#allocation5 + $0xa4] ss:$16 sps:$4 sm:$0xff]   ;;  %v714_v21 = vld [vmem:[#allocation5 + $0xac] ss:$16 sps:$4 sm:$0xff]   ;;  %v716_v22 = vld [vmem:[#allocation5 + $0xa0] ss:$16 sps:$4 sm:$0xff]  }
  0x2f   :  { %v717_v23 = vld [vmem:[#allocation5 + $0xa8] ss:$16 sps:$4 sm:$0xff]   ;;  %v718_v24 = vld [vmem:[#allocation5 + $0xc4] ss:$16 sps:$4 sm:$0xff]   ;;  %v720_v25 = vld [vmem:[#allocation5 + $0xcc] ss:$16 sps:$4 sm:$0xff]  }
  0x30   :  { %v722_v26 = vld [vmem:[#allocation5 + $0xc0] ss:$16 sps:$4 sm:$0xff]   ;;  %v723_v27 = vld [vmem:[#allocation5 + $0xc8] ss:$16 sps:$4 sm:$0xff]   ;;  %v724_v28 = vld [vmem:[#allocation5 + $0xe4] ss:$16 sps:$4 sm:$0xff]  }
  0x31   :  { %466 = vmatpush1.bf16.msra.mxu0 %v698_v10  ;;  %509 = vmatpush1.bf16.msra.mxu1 %v699_v11  ;;  %v726_v29 = vld [vmem:[#allocation5 + $0xec] ss:$16 sps:$4 sm:$0xff]   ;;  %v728_v30 = vld [vmem:[#allocation5 + $0xe0] ss:$16 sps:$4 sm:$0xff]   ;;  %v729_v31 = vld [vmem:[#allocation5 + $0xe8] ss:$16 sps:$4 sm:$0xff]  }
  0x32   :  { %467 = vmatprep.subr.bf16.mxu0 %v700_v12  ;;  %510 = vmatprep.subr.bf16.mxu1 %v702_v13  ;;  %v730_v32 = vld [vmem:[#allocation5 + $0x104] ss:$16 sps:$4 sm:$0xff]   ;;  %v732_v33 = vld [vmem:[#allocation5 + $0x10c] ss:$16 sps:$4 sm:$0xff]   ;;  %v734_v34 = vld [vmem:[#allocation5 + $0x100] ss:$16 sps:$4 sm:$0xff]  }
  0x33   :  { %v735_v35 = vld [vmem:[#allocation5 + $0x108] ss:$16 sps:$4 sm:$0xff]   ;;  %v736_v36 = vld [vmem:[#allocation5 + $0x124] ss:$16 sps:$4 sm:$0xff]   ;;  %v738_v37 = vld [vmem:[#allocation5 + $0x12c] ss:$16 sps:$4 sm:$0xff]  }
  0x34   :  { %v740_v38 = vld [vmem:[#allocation5 + $0x120] ss:$16 sps:$4 sm:$0xff]   ;;  %v741_v39 = vld [vmem:[#allocation5 + $0x128] ss:$16 sps:$4 sm:$0xff]   ;;  %v742_v40 = vld [vmem:[#allocation5 + $0x144] ss:$16 sps:$4 sm:$0xff]  }
  0x35   :  { %468 = vmatpush1.bf16.msra.mxu0 %v704_v14  ;;  %511 = vmatpush1.bf16.msra.mxu1 %v705_v15  ;;  %v744_v41 = vld [vmem:[#allocation5 + $0x14c] ss:$16 sps:$4 sm:$0xff]   ;;  %v746_v42 = vld [vmem:[#allocation5 + $0x140] ss:$16 sps:$4 sm:$0xff]   ;;  %v747_v43 = vld [vmem:[#allocation5 + $0x148] ss:$16 sps:$4 sm:$0xff]  }
  0x36   :  { %469 = vmatprep.subr.bf16.mxu0 %v706_v16  ;;  %512 = vmatprep.subr.bf16.mxu1 %v708_v17  ;;  %v748_v44 = vld [vmem:[#allocation5 + $0x164] ss:$16 sps:$4 sm:$0xff]   ;;  %v750_v45 = vld [vmem:[#allocation5 + $0x16c] ss:$16 sps:$4 sm:$0xff]   ;;  %v752_v47 = vld [vmem:[#allocation5 + $0x160] ss:$16 sps:$4 sm:$0xff]  }
  0x37   :  { %v780_v46 = vld [vmem:[#allocation2 + $0x4] ss:$8 sps:$4 sm:$0xff]   ;;  %v753_v48 = vld [vmem:[#allocation5 + $0x168] ss:$16 sps:$4 sm:$0xff]   ;;  %v758_v51 = vld [vmem:[#allocation5 + $0x180] ss:$16 sps:$4 sm:$0xff]  }
  0x38   :  { %v754_v49 = vld [vmem:[#allocation5 + $0x184] ss:$16 sps:$4 sm:$0xff]   ;;  %v756_v50 = vld [vmem:[#allocation5 + $0x18c] ss:$16 sps:$4 sm:$0xff]   ;;  %493 = vmatprep.mubr.bf16.mxu0 %v780_v46  ;;  %536 = vmatprep.mubr.bf16.mxu1 %v780_v46  ;;  %v759_v52 = vld [vmem:[#allocation5 + $0x188] ss:$16 sps:$4 sm:$0xff]  }
  0x39   :  { %470 = vmatpush1.bf16.msra.mxu0 %v710_v18  ;;  %513 = vmatpush1.bf16.msra.mxu1 %v711_v19  ;;  %v760_v53 = vld [vmem:[#allocation5 + $0x1a4] ss:$16 sps:$4 sm:$0xff]   ;;  %v762_v54 = vld [vmem:[#allocation5 + $0x1ac] ss:$16 sps:$4 sm:$0xff]   ;;  %v764_v55 = vld [vmem:[#allocation5 + $0x1a0] ss:$16 sps:$4 sm:$0xff]  }
  0x3a   :  { %471 = vmatprep.subr.bf16.mxu0 %v712_v20  ;;  %514 = vmatprep.subr.bf16.mxu1 %v714_v21  ;;  %v765_v56 = vld [vmem:[#allocation5 + $0x1a8] ss:$16 sps:$4 sm:$0xff]   ;;  %v766_v57 = vld [vmem:[#allocation5 + $0x1c4] ss:$16 sps:$4 sm:$0xff]   ;;  %v768_v58 = vld [vmem:[#allocation5 + $0x1cc] ss:$16 sps:$4 sm:$0xff]  }
  0x3b   :  { %v770_v59 = vld [vmem:[#allocation5 + $0x1c0] ss:$16 sps:$4 sm:$0xff]   ;;  %v771_v60 = vld [vmem:[#allocation5 + $0x1c8] ss:$16 sps:$4 sm:$0xff]   ;;  %v772_v61 = vld [vmem:[#allocation5 + $0x1e4] ss:$16 sps:$4 sm:$0xff]  }
  0x3c   :  { %v774_v62 = vld [vmem:[#allocation5 + $0x1ec] ss:$16 sps:$4 sm:$0xff]   ;;  %v776_v63 = vld [vmem:[#allocation5 + $0x1e0] ss:$16 sps:$4 sm:$0xff]   ;;  %v777_v0 = vld [vmem:[#allocation5 + $0x1e8] ss:$16 sps:$4 sm:$0xff]  }
  0x3d   :  { %472 = vmatpush1.bf16.msra.mxu0 %v716_v22  ;;  %515 = vmatpush1.bf16.msra.mxu1 %v717_v23  ;;  %v778_v1 = vld [vmem:[#allocation2] ss:$8 sps:$4 sm:$0xff]   ;;  %v112_v3 = vshrl.u32 %v111_v2, 7 }
  0x3e   :  { %473 = vmatprep.subr.bf16.mxu0 %v718_v24  ;;  %516 = vmatprep.subr.bf16.mxu1 %v720_v25  ;;  %v109_v6 = vld [vmem:[%s927_s2] sm:$0xf]  ;;  %s859_s2 = smov [#allocation7]  }
  0x3f   :  { %v113_v4 = vsub.s32 0, %v112_v3  ;;  %v121_v5 = vsub.s32 2, %v112_v3  ;;  %v117_v7 = vsub.s32 1, %v112_v3  ;;  %v125_v8 = vsub.s32 3, %v112_v3  ;;  %s588_s13 = sshll.u32 %s859_s2, 4  ;;  %s589_s13 = int_to_ptr.vmem [resolvable:$true] %s588_s13 }
  0x40   :  { %s825_s14 = scalar_lea.vmem %s589_s13, 512  ;;  %p830_p3 = scmp.lt.s32.totalorder %s589_s13, %s589_s13 }
  0x41   :  { %474 = vmatpush1.bf16.msra.mxu0 %v722_v26  ;;  %517 = vmatpush1.bf16.msra.mxu1 %v723_v27  ;;  %v114_v9 = vrot.slane %v109_v6, %v113_v4  ;;  %v122_v10 = vrot.slane %v109_v6, %v121_v5  ;;  %v118_v11 = vrot.slane %v109_v6, %v117_v7  ;;  %p826_p2 = scmp.ne.s32.totalorder %s589_s13, %s825_s14  ;;  %p831_p4 = scmp.lt.s32.totalorder %s825_s14, %s825_s14 }
  0x42   :  { %475 = vmatprep.subr.bf16.mxu0 %v724_v28  ;;  %518 = vmatprep.subr.bf16.mxu1 %v726_v29  ;;  %v126_v12 = vrot.slane %v109_v6, %v125_v8 }
  0x43   :  { %p832_p5 = por %p831_p4, %p830_p3 }
  0x45   :  { %476 = vmatpush1.bf16.msra.mxu0 %v728_v30  ;;  %519 = vmatpush1.bf16.msra.mxu1 %v729_v31  ;;  %p833_p6 = pnand %p832_p5, %p826_p2 }
  0x46   :  { %477 = vmatprep.subr.bf16.mxu0 %v730_v32  ;;  %520 = vmatprep.subr.bf16.mxu1 %v732_v33 }
  0x49   :  { %478 = vmatpush1.bf16.msra.mxu0 %v734_v34  ;;  %521 = vmatpush1.bf16.msra.mxu1 %v735_v35 }
  0x4a   :  { %479 = vmatprep.subr.bf16.mxu0 %v736_v36  ;;  %522 = vmatprep.subr.bf16.mxu1 %v738_v37 }
  0x4d   :  { %480 = vmatpush1.bf16.msra.mxu0 %v740_v38  ;;  %523 = vmatpush1.bf16.msra.mxu1 %v741_v39 }
  0x4e   :  { %481 = vmatprep.subr.bf16.mxu0 %v742_v40  ;;  %524 = vmatprep.subr.bf16.mxu1 %v744_v41 }
  0x51   :  { %482 = vmatpush1.bf16.msra.mxu0 %v746_v42  ;;  %525 = vmatpush1.bf16.msra.mxu1 %v747_v43 }
  0x52   :  { %483 = vmatprep.subr.bf16.mxu0 %v748_v44  ;;  %526 = vmatprep.subr.bf16.mxu1 %v750_v45 }
  0x55   :  { %484 = vmatpush1.bf16.msra.mxu0 %v752_v47  ;;  %527 = vmatpush1.bf16.msra.mxu1 %v753_v48 }
  0x56   :  { %485 = vmatprep.subr.bf16.mxu0 %v754_v49  ;;  %528 = vmatprep.subr.bf16.mxu1 %v756_v50 }
  0x59   :  { %486 = vmatpush1.bf16.msra.mxu0 %v758_v51  ;;  %529 = vmatpush1.bf16.msra.mxu1 %v759_v52 }
  0x5a   :  { %487 = vmatprep.subr.bf16.mxu0 %v760_v53  ;;  %530 = vmatprep.subr.bf16.mxu1 %v762_v54 }
  0x5d   :  { %488 = vmatpush1.bf16.msra.mxu0 %v764_v55  ;;  %531 = vmatpush1.bf16.msra.mxu1 %v765_v56 }
  0x5e   :  { %489 = vmatprep.subr.bf16.mxu0 %v766_v57  ;;  %532 = vmatprep.subr.bf16.mxu1 %v768_v58 }
  0x61   :  { %490 = vmatpush1.bf16.msra.mxu0 %v770_v59  ;;  %533 = vmatpush1.bf16.msra.mxu1 %v771_v60 }
  0x62   :  { %491 = vmatprep.subr.bf16.mxu0 %v772_v61  ;;  %534 = vmatprep.subr.bf16.mxu1 %v774_v62 }
  0x65   :  { %492 = vmatpush1.bf16.msra.mxu0 %v776_v63  ;;  %535 = vmatpush1.bf16.msra.mxu1 %v777_v0 }
  0x68   :  { %494 = vmatmul.mubr.bf16.vlgmr.msra.gmra.mrb[0].mxu0 %v778_v1  ;;  %537 = vmatmul.mubr.bf16.vlgmr.msra.gmra.mrb[0].mxu1 %v778_v1 }
 0x13b   :  { %v495_v13 = vpop.f32.mrb[0].mxu0  ;;  %v538_v14 = vpop.f32.mrb[0].mxu1 }
 0x13c   :  { %v496_v15 = vadd.f32 %v495_v13, %v114_v9  ;;  %v539_v16 = vadd.f32 %v538_v14, %v122_v10  ;;  %v497_v17 = vpop.f32.mrb[1].mxu0  ;;  %v540_v18 = vpop.f32.mrb[1].mxu1 }
 0x13d   :  { %v498_v19 = vadd.f32 %v497_v17, %v118_v11  ;;  %v541_v20 = vadd.f32 %v540_v18, %v126_v12  ;;  %v499_v21 = vpop.f32.mrb[2].mxu0  ;;  %v542_v22 = vpop.f32.mrb[2].mxu1 }
 0x13e   :  { %v547_v23 = vmax.f32 %v496_v15, 0.0  ;;  %v549_v24 = vmax.f32 %v539_v16, 0.0  ;;  %v500_v25 = vadd.f32 %v499_v21, %v114_v9  ;;  %v543_v26 = vadd.f32 %v542_v22, %v122_v10  ;;  %v501_v27 = vpop.f32.mrb[3].mxu0  ;;  %v544_v28 = vpop.f32.mrb[3].mxu1 }
 0x13f   :  { %v548_v29 = vmax.f32 %v498_v19, 0.0  ;;  %v550_v30 = vmax.f32 %v541_v20, 0.0  ;;  %v502_v31 = vadd.f32 %v501_v27, %v118_v11  ;;  %v545_v32 = vadd.f32 %v544_v28, %v126_v12 }
 0x140   :  { %v551_v33 = vmax.f32 %v500_v25, 0.0  ;;  %v553_v34 = vmax.f32 %v543_v26, 0.0 }
 0x141   :  { %v671_v35 = vpack.c.bf16 %v548_v29, %v547_v23  ;;  %v672_v36 = vpack.c.bf16 %v550_v30, %v549_v24  ;;  %v552_v37 = vmax.f32 %v502_v31, 0.0  ;;  %v554_v38 = vmax.f32 %v545_v32, 0.0 }
 0x143   :  { %579 = vst [vmem:[#allocation7] sm:$0xff] %v671_v35  ;;  %580 = vst [vmem:[#allocation7 + $0x8] sm:$0xff] %v672_v36  ;;  %v673_v39 = vpack.c.bf16 %v552_v37, %v551_v33  ;;  %v674_v40 = vpack.c.bf16 %v554_v38, %v553_v34 }
 0x145   :  { %581 = vst [vmem:[#allocation7 + $0x10] sm:$0xff] %v673_v39  ;;  %582 = vst [vmem:[#allocation7 + $0x18] sm:$0xff] %v674_v40 }
 0x146   :  { %836 = shalt.err (!%p833_p6)
}
 0x147   :  { %s837_s17 = scalar_lea.hbm %s928_s3, 512 }
 0x148   :  { %p838_p7 = scmp.ne.s32.totalorder %s928_s3, %s837_s17  ;;  %p841_p8 = scmp.lt.u32.totalorder %s837_s17, %s928_s3 }
 0x14a   :  { %p843_p9 = pnand %p841_p8, %p838_p7 }
 0x14c   :  { %846 = shalt.err (!%p843_p9)
}
 0x14d   :  { %594 = dma.vmem_to_hbm [thread:$0]  %s589_s13, 512, %s928_s3, [#allocation4], %s857_s0, %s857_s0, %s858_s9  }
 0x14e   :  { %851 = dma.done.wait [#allocation4], 512  }
 0x14f   :  { %852 = vsyncadd [#allocation4], 4294966784 }
 0x150   :  { %598 = vsyncpa [#allocation3], 1 }
 0x151   :  { %599 = vsyncpa [#allocation6], 1 }
 0x152   :  { %600 = vsyncpa [#allocation4], 1 }

</bundles_post_ra>
